<compile_context>
chip_gen: v6e
topology: v6e:2x2x1
jax: 0.10.0
libtpu: 0.0.40
codegen_flags: <defaults>
</compile_context>

<pallas_src>
import jax
import jax.numpy as jnp
from jax.experimental import pallas as pl
from jax.experimental.pallas import tpu as pltpu


def _gelu_new(x):
    # GPT-2 "gelu_new": 0.5 * x * (1 + tanh(sqrt(2/pi) * (x + 0.044715 x^3)))
    c = 0.7978845608028654  # sqrt(2/pi)
    return 0.5 * x * (1.0 + jnp.tanh(c * (x + 0.044715 * x * x * x)))


def _round_up(x, m):
    return (x + m - 1) // m * m


# ----------------------------------------------------------------------------
# Fused adapter kernel: one (tm, nx_p) output tile per grid step.
# Weights are fully resident in VMEM (constant block index), so there is no
# contraction grid axis and no accumulator scratch.
# ----------------------------------------------------------------------------
def _fused_adapter_kernel(x_ref, wfc_ref, bfc_ref, wproj_ref, bproj_ref, o_ref):
    # c_fc: (tm, nx_p) @ (nx_p, ns_p) -- bf16 operands, f32 MXU accumulation.
    x = x_ref[...].astype(jnp.bfloat16)
    h = jnp.dot(x, wfc_ref[...], preferred_element_type=jnp.float32)
    h = _gelu_new(h + bfc_ref[...].astype(jnp.float32))

    # c_proj: (tm, ns_p) @ (ns_p, nx_p) -- intermediate h never leaves VMEM.
    out = jnp.dot(h.astype(jnp.bfloat16), wproj_ref[...],
                  preferred_element_type=jnp.float32)
    out = out + bproj_ref[...].astype(jnp.float32)
    o_ref[...] = out.astype(o_ref.dtype)


def _choose_tm(M, nx_p, ns_p, budget_bytes=8 * 1024 * 1024):
    """Largest 8/128-aligned row tile that fits a conservative VMEM budget
    (double-buffered x/out tiles in f32 + the f32 intermediate h), preferring
    >= 2 grid steps so v7x megacore can split the M axis."""
    m_cap = _round_up(M, 8)
    for tm in (1024, 512, 256, 128, 64, 32, 16, 8):
        if tm > m_cap:
            continue
        est = 2 * 2 * tm * nx_p * 4 + tm * ns_p * 4
        if est > budget_bytes:
            continue
        if tm > 128 and _round_up(M, tm) // tm < 2:
            continue  # keep >= 2 grid steps for the megacore split
        return tm
    return 8


# ----------------------------------------------------------------------------
# AdapterMLP forward
# ----------------------------------------------------------------------------
def adapter_mlp_forward(params, x):
    """x: (B, T, nx) -> (B, T, nx)."""
    B, T, nx = x.shape
    n_state = params["w_fc"].shape[1]
    assert params["w_fc"].shape == (nx, n_state)
    assert params["b_fc"].shape == (n_state,)
    assert params["w_proj"].shape == (n_state, nx)
    assert params["b_proj"].shape == (nx,)

    M = B * T
    nx_p = _round_up(nx, 128)       # lane-dense output / contraction widths
    ns_p = _round_up(n_state, 128)

    # Both weights stay resident in VMEM for the whole grid; this fused path
    # targets adapter-sized widths (a few MB at most, bf16).
    resident_weight_bytes = 2 * 2 * nx_p * ns_p  # two bf16 matrices
    assert resident_weight_bytes <= 8 * 1024 * 1024, (
        "TODO(synk): tile the contraction axes for very wide layers")

    tm = _choose_tm(M, nx_p, ns_p)
    M_p = _round_up(M, tm)

    # Zero-padding is exact here: padded x columns / weight rows contribute 0,
    # padded b_fc columns give gelu_new(0) = 0, padded output cols are sliced.
    x2d = x.reshape(M, nx)
    x_p = jnp.pad(x2d, ((0, M_p - M), (0, nx_p - nx)))
    w_fc = jnp.pad(params["w_fc"],
                   ((0, nx_p - nx), (0, ns_p - n_state))).astype(jnp.bfloat16)
    w_proj = jnp.pad(params["w_proj"],
                     ((0, ns_p - n_state), (0, nx_p - nx))).astype(jnp.bfloat16)
    b_fc = jnp.pad(params["b_fc"], (0, ns_p - n_state)
                   ).reshape(1, ns_p).astype(jnp.float32)
    b_proj = jnp.pad(params["b_proj"], (0, nx_p - nx)
                     ).reshape(1, nx_p).astype(jnp.float32)

    grid = (M_p // tm,)

    out_p = pl.pallas_call(
        _fused_adapter_kernel,
        out_shape=jax.ShapeDtypeStruct((M_p, nx_p), x.dtype),
        grid_spec=pltpu.PrefetchScalarGridSpec(
            num_scalar_prefetch=0,
            grid=grid,
            in_specs=[
                pl.BlockSpec((tm, nx_p), lambda i: (i, 0)),    # x row tile
                pl.BlockSpec((nx_p, ns_p), lambda i: (0, 0)),  # W_fc (resident)
                pl.BlockSpec((1, ns_p), lambda i: (0, 0)),     # b_fc
                pl.BlockSpec((ns_p, nx_p), lambda i: (0, 0)),  # W_proj (resident)
                pl.BlockSpec((1, nx_p), lambda i: (0, 0)),     # b_proj
            ],
            out_specs=pl.BlockSpec((tm, nx_p), lambda i: (i, 0)),
        ),
        compiler_params=pltpu.CompilerParams(
            dimension_semantics=("parallel",),   # shards M across v7x TCs
            vmem_limit_bytes=32 * 1024 * 1024,   # explicit (v5e default is 16 MiB)
        ),
    )(x_p, w_fc, b_fc, w_proj, b_proj)

    # TODO(synk): nn.Dropout(resid_pdrop) omitted (inference-mode identity).
    return out_p[:M, :nx].reshape(B, T, nx)


# ----------------------------------------------------------------------------
# Pure-JAX f32 reference (mirrors the PyTorch forward) for validation
# ----------------------------------------------------------------------------
def adapter_mlp_reference(params, x):
    h = _gelu_new(x @ params["w_fc"] + params["b_fc"])
    return h @ params["w_proj"] + params["b_proj"]


if __name__ == "__main__":
    B, T, nx, n_state = 2, 8, 32, 128   # small demo shapes (n_embd=32, adapter width=128)

    key = jax.random.PRNGKey(0)
    k_x, k_w1, k_b1, k_w2, k_b2 = jax.random.split(key, 5)

    params = {
        "w_fc": 0.02 * jax.random.normal(k_w1, (nx, n_state), dtype=jnp.float32),
        "b_fc": 0.01 * jax.random.normal(k_b1, (n_state,), dtype=jnp.float32),
        "w_proj": 0.02 * jax.random.normal(k_w2, (n_state, nx), dtype=jnp.float32),
        "b_proj": 0.01 * jax.random.normal(k_b2, (nx,), dtype=jnp.float32),
    }

    x = jax.random.normal(k_x, (B, T, nx), dtype=jnp.float32)

    out = adapter_mlp_forward(params, x)
    out = jax.block_until_ready(out)

    ref = adapter_mlp_reference(params, x)
    assert out.shape == (B, T, nx)
    # Kernel runs the matmuls bf16-in / f32-acc, so compare against the f32
    # reference with a bf16-appropriate tolerance.
    assert jnp.allclose(out, ref, atol=1e-2, rtol=1e-2), "mismatch vs reference"

    print("KERNEL_OK")
</pallas_src>

<mosaic_0001>
module attributes {stable_mosaic.version = 11 : i64} {
  func.func @_fused_adapter_kernel(%arg0: i32, %arg1: memref<16x128xf32, #tpu.memory_space<vmem>>, %arg2: memref<128x128xbf16, #tpu.memory_space<vmem>>, %arg3: memref<1x128xf32, #tpu.memory_space<vmem>>, %arg4: memref<128x128xbf16, #tpu.memory_space<vmem>>, %arg5: memref<1x128xf32, #tpu.memory_space<vmem>>, %arg6: memref<16x128xf32, #tpu.memory_space<vmem>>) attributes {dimension_semantics = [#tpu.dimension_semantics<parallel>], iteration_bounds = array<i64: 1>, scalar_prefetch = 0 : i64, scratch_operands = 0 : i64, tpu.core_type = #tpu.core_type<tc>, window_params = [{transform_indices = @transform_0, window_bounds = array<i64: 16, 128>}, {pipeline_mode = #tpu.pipeline_mode<synchronous>, transform_indices = @transform_1, window_bounds = array<i64: 128, 128>}, {pipeline_mode = #tpu.pipeline_mode<synchronous>, transform_indices = @transform_2, window_bounds = array<i64: 1, 128>}, {pipeline_mode = #tpu.pipeline_mode<synchronous>, transform_indices = @transform_3, window_bounds = array<i64: 128, 128>}, {pipeline_mode = #tpu.pipeline_mode<synchronous>, transform_indices = @transform_4, window_bounds = array<i64: 1, 128>}, {transform_indices = @transform_5, window_bounds = array<i64: 16, 128>}]} {
    %c0 = arith.constant 0 : index
    %c0_0 = arith.constant 0 : index
    %0 = vector.load %arg1[%c0, %c0_0] : memref<16x128xf32, #tpu.memory_space<vmem>>, vector<16x128xf32>
    %1 = arith.truncf %0 : vector<16x128xf32> to vector<16x128xbf16>
    %c0_1 = arith.constant 0 : index
    %c0_2 = arith.constant 0 : index
    %2 = vector.load %arg2[%c0_1, %c0_2] : memref<128x128xbf16, #tpu.memory_space<vmem>>, vector<128x128xbf16>
    %cst = arith.constant dense<0.000000e+00> : vector<16x128xf32>
    %3 = tpu.matmul %1, %2, %cst {dimension_numbers = #tpu.dot_dimension_numbers<[1], [0], [0], [1], [0, 0, 1, 1], [], []>} : vector<16x128xbf16>, vector<128x128xbf16>, vector<16x128xf32> -> vector<16x128xf32>
    %c0_3 = arith.constant 0 : index
    %c0_4 = arith.constant 0 : index
    %4 = vector.load %arg3[%c0_3, %c0_4] : memref<1x128xf32, #tpu.memory_space<vmem>>, vector<1x128xf32>
    %5 = vector.broadcast %4 : vector<1x128xf32> to vector<16x128xf32>
    %6 = arith.addf %3, %5 : vector<16x128xf32>
    %cst_5 = arith.constant 5.000000e-01 : f32
    %7 = vector.broadcast %cst_5 : f32 to vector<16x128xf32>
    %8 = arith.mulf %7, %6 : vector<16x128xf32>
    %cst_6 = arith.constant 4.471500e-02 : f32
    %9 = vector.broadcast %cst_6 : f32 to vector<16x128xf32>
    %10 = arith.mulf %9, %6 : vector<16x128xf32>
    %11 = arith.mulf %10, %6 : vector<16x128xf32>
    %12 = arith.mulf %11, %6 : vector<16x128xf32>
    %13 = arith.addf %6, %12 : vector<16x128xf32>
    %cst_7 = arith.constant 0.797884583 : f32
    %14 = vector.broadcast %cst_7 : f32 to vector<16x128xf32>
    %15 = arith.mulf %14, %13 : vector<16x128xf32>
    %16 = math.tanh %15 : vector<16x128xf32>
    %cst_8 = arith.constant 1.000000e+00 : f32
    %17 = vector.broadcast %cst_8 : f32 to vector<16x128xf32>
    %18 = arith.addf %17, %16 : vector<16x128xf32>
    %19 = arith.mulf %8, %18 : vector<16x128xf32>
    %20 = arith.truncf %19 : vector<16x128xf32> to vector<16x128xbf16>
    %c0_9 = arith.constant 0 : index
    %c0_10 = arith.constant 0 : index
    %21 = vector.load %arg4[%c0_9, %c0_10] : memref<128x128xbf16, #tpu.memory_space<vmem>>, vector<128x128xbf16>
    %cst_11 = arith.constant dense<0.000000e+00> : vector<16x128xf32>
    %22 = tpu.matmul %20, %21, %cst_11 {dimension_numbers = #tpu.dot_dimension_numbers<[1], [0], [0], [1], [0, 0, 1, 1], [], []>} : vector<16x128xbf16>, vector<128x128xbf16>, vector<16x128xf32> -> vector<16x128xf32>
    %c0_12 = arith.constant 0 : index
    %c0_13 = arith.constant 0 : index
    %23 = vector.load %arg5[%c0_12, %c0_13] : memref<1x128xf32, #tpu.memory_space<vmem>>, vector<1x128xf32>
    %24 = vector.broadcast %23 : vector<1x128xf32> to vector<16x128xf32>
    %25 = arith.addf %22, %24 : vector<16x128xf32>
    %c0_14 = arith.constant 0 : index
    %c0_15 = arith.constant 0 : index
    %26 = vector.load %arg6[%c0_14, %c0_15] : memref<16x128xf32, #tpu.memory_space<vmem>>, vector<16x128xf32>
    tpu.vector_store %arg6[%c0_14, %c0_15], %25 {strides = array<i32>} : memref<16x128xf32, #tpu.memory_space<vmem>>, vector<16x128xf32>,
    return
  }
  func.func @transform_0(%arg0: i32) -> (i32, i32) {
    %c0_i32 = arith.constant 0 : i32
    %c0_i32_0 = arith.constant 0 : i32
    return %arg0, %c0_i32 : i32, i32
  }
  func.func @transform_1(%arg0: i32) -> (i32, i32) {
    %c0_i32 = arith.constant 0 : i32
    %c0_i32_0 = arith.constant 0 : i32
    %c0_i32_1 = arith.constant 0 : i32
    return %c0_i32, %c0_i32_0 : i32, i32
  }
  func.func @transform_2(%arg0: i32) -> (i32, i32) {
    %c0_i32 = arith.constant 0 : i32
    %c0_i32_0 = arith.constant 0 : i32
    %c0_i32_1 = arith.constant 0 : i32
    return %c0_i32, %c0_i32_0 : i32, i32
  }
  func.func @transform_3(%arg0: i32) -> (i32, i32) {
    %c0_i32 = arith.constant 0 : i32
    %c0_i32_0 = arith.constant 0 : i32
    %c0_i32_1 = arith.constant 0 : i32
    return %c0_i32, %c0_i32_0 : i32, i32
  }
  func.func @transform_4(%arg0: i32) -> (i32, i32) {
    %c0_i32 = arith.constant 0 : i32
    %c0_i32_0 = arith.constant 0 : i32
    %c0_i32_1 = arith.constant 0 : i32
    return %c0_i32, %c0_i32_0 : i32, i32
  }
  func.func @transform_5(%arg0: i32) -> (i32, i32) {
    %c0_i32 = arith.constant 0 : i32
    %c0_i32_0 = arith.constant 0 : i32
    return %arg0, %c0_i32 : i32, i32
  }
}

</mosaic_0001>

<bundles_post_ra>
// kernel: tpu_custom_call.1
= control target key start
LH: loop header
LB: loop body
LE: loop exit
PB: predicated region body
PF: predicated region fallthrough
CT: control target
= control target key end

     0   :  { %10 = vsyncpa [#allocation3], 0  ;;  %s585_s0 = inlined_call_operand.hbm [shape: f32[16,128], index: 0, kind: input, shape index: {}]   ;;  %s586_s1 = inlined_call_operand.hbm [shape: bf16[128,128], index: 1, kind: input, shape index: {}]   ;;  %s587_s2 = inlined_call_operand.vmem [shape: f32[1,128], index: 2, kind: input, shape index: {}]   ;;  %s588_s3 = inlined_call_operand.hbm [shape: bf16[128,128], index: 3, kind: input, shape index: {}]   ;;  %s589_s4 = inlined_call_operand.vmem [shape: f32[1,128], index: 4, kind: input, shape index: {}]   ;;  %s590_s5 = inlined_call_operand.hbm [shape: f32[16,128], index: 5, kind: output, shape index: {}]  }
   0x1   :  { %11 = vsyncpa [#allocation6], 0 }
   0x2   :  { %12 = vsyncpa [#allocation4], 0  ;;  %s521_s18 = smov [#allocation5]  }
   0x3   :  { %s30_s19 = sshll.u32 %s521_s18, 4  ;;  %s31_s19 = int_to_ptr.vmem [resolvable:$true] %s30_s19 }
   0x4   :  { %s443_s20 = scalar_lea.vmem %s31_s19, 1024  ;;  %p448_p1 = scmp.lt.s32.totalorder %s31_s19, %s31_s19 }
   0x5   :  { %p444_p0 = scmp.ne.s32.totalorder %s31_s19, %s443_s20  ;;  %p449_p2 = scmp.lt.s32.totalorder %s443_s20, %s443_s20 }
   0x7   :  { %p450_p3 = por %p449_p2, %p448_p1 }
   0x9   :  { %p451_p4 = pnand %p450_p3, %p444_p0 }
   0xb   :  { %454 = shalt.err (!%p451_p4)
}
   0xc   :  { %s522_s21 = smov 64   ;;  %s523_s22 = smov 4  }
   0xd   :  { %36 = dma.hbm_to_vmem [thread:$0]  %s586_s1, 1024, %s31_s19, [#allocation6], %s522_s21, %s522_s21, %s523_s22  }
   0xe   :  { %s524_s25 = smov [#allocation2]  }
   0xf   :  { %s18_s26 = sshll.u32 %s524_s25, 4  ;;  %s19_s26 = int_to_ptr.vmem [resolvable:$true] %s18_s26 }
  0x10   :  { %s463_s27 = scalar_lea.vmem %s19_s26, 256  ;;  %p468_p6 = scmp.lt.s32.totalorder %s19_s26, %s19_s26 }
  0x11   :  { %p464_p5 = scmp.ne.s32.totalorder %s19_s26, %s463_s27  ;;  %p469_p7 = scmp.lt.s32.totalorder %s463_s27, %s463_s27 }
  0x13   :  { %p470_p8 = por %p469_p7, %p468_p6 }
  0x15   :  { %p471_p9 = pnand %p470_p8, %p464_p5 }
  0x17   :  { %474 = shalt.err (!%p471_p9)
}
  0x18   :  { %s525_s28 = smov 128   ;;  %s526_s29 = smov 8  }
  0x19   :  { %24 = dma.hbm_to_vmem [thread:$0]  %s585_s0, 256, %s19_s26, [#allocation3], %s525_s28, %s525_s28, %s526_s29  }
  0x1a   :  { %s527_s1 = smov [#allocation7]  }
  0x1b   :  { %s44_s7 = sshll.u32 %s527_s1, 4  ;;  %s45_s7 = int_to_ptr.vmem [resolvable:$true] %s44_s7 }
  0x1c   :  { %s483_s8 = scalar_lea.vmem %s45_s7, 1024  ;;  %p488_p11 = scmp.lt.s32.totalorder %s45_s7, %s45_s7 }
  0x1d   :  { %p484_p10 = scmp.ne.s32.totalorder %s45_s7, %s483_s8  ;;  %p489_p12 = scmp.lt.s32.totalorder %s483_s8, %s483_s8 }
  0x1f   :  { %p490_p13 = por %p489_p12, %p488_p11 }
  0x21   :  { %p491_p0 = pnand %p490_p13, %p484_p10 }
  0x23   :  { %494 = shalt.err (!%p491_p0)
}
  0x24   :  { %50 = dma.hbm_to_vmem [thread:$0]  %s588_s3, 1024, %s45_s7, [#allocation6], %s522_s21, %s522_s21, %s523_s22  }
  0x25   :  { %515 = dma.done.wait [#allocation3], 256  }
  0x26   :  { %516 = vsyncadd [#allocation3], 4294967040 }
  0x27   :  { %517 = dma.done.wait [#allocation6], 2048  }
  0x28   :  { %518 = vsyncadd [#allocation6], 4294965248  ;;  %v528_v0 = vmov 0.0   ;;  %vm529_vm0 = vmmov 0   ;;  %v415_v1 = vld [vmem:[#allocation5 + $0x38] sm:$0xff]   ;;  %v416_v2 = vld [vmem:[#allocation5 + $0x30] sm:$0xff]  }
  0x29   :  { %365 = vmatprep.subr.bf16.mxu0 %v528_v0  ;;  %381 = vmatprep.mubr.msk.bf16.mxu0 %vm529_vm0, %v528_v0  ;;  %v417_v3 = vld [vmem:[#allocation5 + $0x28] sm:$0xff]   ;;  %v418_v4 = vld [vmem:[#allocation5 + $0x20] sm:$0xff]   ;;  %v419_v5 = vld [vmem:[#allocation5 + $0x18] sm:$0xff]   ;;  %s530_s12 = smov [#allocation8]  }
  0x2a   :  { %385 = vmatprep.subr.bf16.mxu1 %v528_v0  ;;  %401 = vmatprep.mubr.msk.bf16.mxu1 %vm529_vm0, %v528_v0  ;;  %v420_v6 = vld [vmem:[#allocation5 + $0x10] sm:$0xff]   ;;  %v421_v7 = vld [vmem:[#allocation5 + $0x8] sm:$0xff]   ;;  %v422_v8 = vld [vmem:[#allocation5] sm:$0xff]   ;;  %s316_s13 = sshll.u32 %s530_s12, 4  ;;  %s317_s13 = int_to_ptr.vmem [resolvable:$true] %s316_s13 }
  0x2b   :  { %366 = vmatpush3.bf16.msra.mxu0 %v415_v1  ;;  %v63_v9 = vld [vmem:[#allocation2] sm:$0xff]  ;;  %v64_v10 = vld [vmem:[#allocation2 + $0x8] sm:$0xff]  ;;  %v425_v14 = vld [vmem:[#allocation7 + $0x28] sm:$0xff]   ;;  %s495_s14 = scalar_lea.vmem %s317_s13, 256  ;;  %p500_p2 = scmp.lt.s32.totalorder %s317_s13, %s317_s13 }
  0x2c   :  { %367 = vmatprep.subr.bf16.mxu0 %v528_v0  ;;  %v65_v11 = vpack.c.bf16 %v64_v10, %v63_v9  ;;  %v423_v12 = vld [vmem:[#allocation7 + $0x38] sm:$0xff]   ;;  %v424_v13 = vld [vmem:[#allocation7 + $0x30] sm:$0xff]   ;;  %v426_v15 = vld [vmem:[#allocation7 + $0x20] sm:$0xff]   ;;  %p496_p1 = scmp.ne.s32.totalorder %s317_s13, %s495_s14  ;;  %p501_p3 = scmp.lt.s32.totalorder %s495_s14, %s495_s14 }
  0x2d   :  { %386 = vmatpush3.bf16.msra.mxu1 %v423_v12  ;;  %v427_v16 = vld [vmem:[#allocation7 + $0x18] sm:$0xff]   ;;  %v428_v17 = vld [vmem:[#allocation7 + $0x10] sm:$0xff]   ;;  %v429_v18 = vld [vmem:[#allocation7 + $0x8] sm:$0xff]  }
  0x2e   :  { %387 = vmatprep.subr.bf16.mxu1 %v528_v0  ;;  %v430_v19 = vld [vmem:[#allocation7] sm:$0xff]   ;;  %v329_v20 = vld [vmem:[%s587_s2] ss:$0 sm:$0xff]  ;;  %p502_p4 = por %p501_p3, %p500_p2 }
  0x2f   :  { %368 = vmatpush3.bf16.msra.mxu0 %v416_v2  ;;  %v338_v46 = vld [vmem:[%s589_s4] ss:$0 sm:$0xff] }
  0x30   :  { %369 = vmatprep.subr.bf16.mxu0 %v528_v0  ;;  %p503_p5 = pnand %p502_p4, %p496_p1 }
  0x31   :  { %388 = vmatpush3.bf16.msra.mxu1 %v424_v13 }
  0x32   :  { %389 = vmatprep.subr.bf16.mxu1 %v528_v0 }
  0x33   :  { %370 = vmatpush3.bf16.msra.mxu0 %v417_v3 }
  0x34   :  { %371 = vmatprep.subr.bf16.mxu0 %v528_v0 }
  0x35   :  { %390 = vmatpush3.bf16.msra.mxu1 %v425_v14 }
  0x36   :  { %391 = vmatprep.subr.bf16.mxu1 %v528_v0 }
  0x37   :  { %372 = vmatpush3.bf16.msra.mxu0 %v418_v4 }
  0x38   :  { %373 = vmatprep.subr.bf16.mxu0 %v528_v0 }
  0x39   :  { %392 = vmatpush3.bf16.msra.mxu1 %v426_v15 }
  0x3a   :  { %393 = vmatprep.subr.bf16.mxu1 %v528_v0 }
  0x3b   :  { %374 = vmatpush3.bf16.msra.mxu0 %v419_v5 }
  0x3c   :  { %375 = vmatprep.subr.bf16.mxu0 %v528_v0 }
  0x3d   :  { %394 = vmatpush3.bf16.msra.mxu1 %v427_v16 }
  0x3e   :  { %395 = vmatprep.subr.bf16.mxu1 %v528_v0 }
  0x3f   :  { %376 = vmatpush3.bf16.msra.mxu0 %v420_v6 }
  0x40   :  { %377 = vmatprep.subr.bf16.mxu0 %v528_v0 }
  0x41   :  { %396 = vmatpush3.bf16.msra.mxu1 %v428_v17 }
  0x42   :  { %397 = vmatprep.subr.bf16.mxu1 %v528_v0 }
  0x43   :  { %378 = vmatpush3.bf16.msra.mxu0 %v421_v7 }
  0x44   :  { %379 = vmatprep.subr.bf16.mxu0 %v528_v0 }
  0x45   :  { %398 = vmatpush3.bf16.msra.mxu1 %v429_v18 }
  0x46   :  { %399 = vmatprep.subr.bf16.mxu1 %v528_v0 }
  0x47   :  { %380 = vmatpush3.bf16.msra.mxu0 %v422_v8 }
  0x49   :  { %400 = vmatpush3.bf16.msra.mxu1 %v430_v19 }
  0x4a   :  { %382 = vmatmul.mubr.bf16.vlgmr.msra.gmra.mxu0 %v65_v11 }
 0x10a   :  { %v171_v21 = vpop.f32.mrf.mxu0 }
 0x10b   :  { %v172_v22 = vadd.f32 %v329_v20, %v171_v21 }
 0x10c   :  { %v383_v23 = vpop.f32.mrf.mxu0 }
 0x10d   :  { %v180_v24 = vmul.f32 0.044715, %v172_v22  ;;  %v178_v40 = vmul.f32 0.5, %v172_v22 }
 0x10e   :  { %v174_v25 = vpop.f32.mrf.mxu0 }
 0x10f   :  { %v182_v26 = vmul.f32 %v180_v24, %v172_v22  ;;  %v175_v27 = vadd.f32 %v329_v20, %v174_v25 }
 0x110   :  { %v384_v28 = vpop.f32.mrf.mxu0 }
 0x111   :  { %v184_v29 = vmul.f32 %v182_v26, %v172_v22  ;;  %v181_v30 = vmul.f32 0.044715, %v175_v27  ;;  %v179_v41 = vmul.f32 0.5, %v175_v27 }
 0x113   :  { %v183_v31 = vmul.f32 %v181_v30, %v175_v27  ;;  %v186_v32 = vadd.f32 %v184_v29, %v172_v22 }
 0x115   :  { %v185_v33 = vmul.f32 %v183_v31, %v175_v27  ;;  %v188_v34 = vmul.f32 0.7978846, %v186_v32 }
 0x117   :  { %v187_v35 = vadd.f32 %v185_v33, %v175_v27  ;;  %431 = vtanh.f32 %v188_v34 }
 0x119   :  { %v189_v36 = vmul.f32 0.7978846, %v187_v35 }
 0x11b   :  { %433 = vtanh.f32 %v189_v36 }
 0x124   :  { %v432_v37 = vpop.eup %431 }
 0x125   :  { %v192_v38 = vadd.f32 1.0, %v432_v37 }
 0x127   :  { %v194_v43 = vmul.f32 %v192_v38, %v178_v40 }
 0x128   :  { %v434_v39 = vpop.eup %433 }
 0x129   :  { %v193_v42 = vadd.f32 1.0, %v434_v39 }
 0x12b   :  { %v195_v44 = vmul.f32 %v193_v42, %v179_v41 }
 0x12d   :  { %v196_v45 = vpack.c.bf16 %v195_v44, %v194_v43 }
 0x12f   :  { %402 = vmatmul.mubr.bf16.vlgmr.msra.gmra.mxu1 %v196_v45 }
 0x1ef   :  { %v302_v47 = vpop.f32.mrf.mxu1 }
 0x1f0   :  { %v303_v48 = vadd.f32 %v338_v46, %v302_v47 }
 0x1f1   :  { %v403_v49 = vpop.f32.mrf.mxu1 }
 0x1f2   :  { %309 = vst [vmem:[#allocation8] sm:$0xff] %v303_v48 }
 0x1f3   :  { %v305_v50 = vpop.f32.mrf.mxu1 }
 0x1f4   :  { %v306_v51 = vadd.f32 %v338_v46, %v305_v50 }
 0x1f5   :  { %v404_v52 = vpop.f32.mrf.mxu1 }
 0x1f6   :  { %310 = vst [vmem:[#allocation8 + $0x8] sm:$0xff] %v306_v51 }
 0x1f7   :  { %506 = shalt.err (!%p503_p5)
}
 0x1f8   :  { %322 = dma.vmem_to_hbm [thread:$0]  %s317_s13, 256, %s590_s5, [#allocation4], %s525_s28, %s525_s28, %s526_s29  }
 0x1f9   :  { %519 = dma.done.wait [#allocation4], 256  }
 0x1fa   :  { %520 = vsyncadd [#allocation4], 4294967040 }
 0x1fb   :  { %326 = vsyncpa [#allocation3], 1 }
 0x1fc   :  { %327 = vsyncpa [#allocation6], 1 }
 0x1fd   :  { %328 = vsyncpa [#allocation4], 1 }

</bundles_post_ra>
